<compile_context>
chip_gen: v5e
topology: v5e:2x2
jax: 0.10.0
libtpu: 0.0.40
codegen_flags: <defaults>
</compile_context>

<pallas_src>
import functools

import jax
import jax.numpy as jnp
from jax import lax
from jax.experimental import pallas as pl
from jax.experimental.pallas import tpu as pltpu


def _sogclr_kernel(zq_ref, zjt_ref, dT_r_ref, dT_c_ref, sI_old_ref, sT_old_ref,
                   loss_ref, sI_new_ref, sT_new_ref,
                   m_col_ref, e_col_ref, a_col_ref, img_acc_ref,
                   *, batch_size, temperature, gamma, alpha_weight, eps):
    B = batch_size
    T = float(temperature)
    denom = float(B - 1)

    q = pl.program_id(0)
    nq = pl.num_programs(0)

    old_b_T = sT_old_ref[0:1, :]                                  # [1, B]

    @pl.when(q == 0)
    def _init():
        # Running column max starts at the old per-column max b_T.
        m_col_ref[...] = old_b_T
        e_col_ref[...] = jnp.zeros_like(e_col_ref)
        a_col_ref[...] = jnp.zeros_like(a_col_ref)
        img_acc_ref[...] = jnp.zeros_like(img_acc_ref)

    # ---- similarity tile (already /T: 1/T folded into the bf16 LHS rows) ----
    # zq_ref: [TQ, Dp] bf16 (normalized * 1/T),  zjt_ref: [Dp, B] bf16 (normalized)
    simT = lax.dot_general(zq_ref[...], zjt_ref[...],
                           (((1,), (0,)), ((), ())),
                           preferred_element_type=jnp.float32)     # [TQ, B] f32

    dT_r = dT_r_ref[...]                                           # [TQ, 1] diag/T
    dT_c = dT_c_ref[...]                                           # [1,  B]
    old_b_I = sI_old_ref[:, 0:1]                                   # [TQ, 1]
    old_s_I = sI_old_ref[:, 1:2]                                   # [TQ, 1]

    # ---------------- image (row) side: fully local to the tile ----------------
    row_max = jnp.max(simT, axis=1, keepdims=True)                 # [TQ, 1]
    new_b_I = jnp.maximum(row_max - dT_r, old_b_I)                 # [TQ, 1]
    c_row = dT_r + new_b_I                                         # [TQ, 1]

    # One TQxB exp per tile: e_all[i,j] = exp(img_dt[i,j] - new_b_I[i]) <= ~1
    e_all = jnp.exp(simT - c_row)                                  # [TQ, B]
    p = e_all * simT                                               # [TQ, B]

    # Analytic diagonal subtraction (replaces the iota/compare/select mask):
    # the diagonal entry of e_all is exp(-new_b_I) (img_dt_ii == 0).
    e_diag_r = jnp.exp(-new_b_I)                                   # [TQ, 1]
    e_row = jnp.sum(e_all, axis=1, keepdims=True) - e_diag_r       # sum_j!=i e
    a_rowT = jnp.sum(p, axis=1, keepdims=True) - dT_r * e_diag_r   # sum_j!=i e*simT

    g_I = e_row / denom
    s_I = (1.0 - gamma) * old_s_I * jnp.exp(old_b_I - new_b_I) + gamma * g_I
    # state outputs (pre-clamp, matching the PyTorch buffer updates)
    sI_new_ref[:, 0:1] = new_b_I
    sI_new_ref[:, 1:2] = s_I
    s_I_c = jnp.maximum(s_I, eps)
    # sum_j w_img * image_diffs = T * (sum e*simT - dT_i * sum e) / s_I
    img_rows = (a_rowT - dT_r * e_row) * (T / denom) / s_I_c       # [TQ, 1]
    img_total = img_acc_ref[...] + jnp.sum(img_rows, axis=0, keepdims=True)
    img_acc_ref[...] = img_total

    # -------- text (column) side: online accumulation across row tiles --------
    col_max = jnp.max(simT, axis=0, keepdims=True)                 # [1, B]
    m_prev = m_col_ref[...]
    m_new = jnp.maximum(m_prev, col_max - dT_c)                    # [1, B]
    rescale = jnp.exp(m_prev - m_new)                              # [1, B] (<= 1)

    # Rank-1 correction: exp(txt_dt - m_new) = e_all * exp(c_row) * exp(-(dT_c + m_new)).
    # A balanced scalar shift + clamps keep both factors finite in f32.
    v = dT_c + m_new                                               # [1, B]
    s_shift = 0.5 * (jnp.max(c_row, axis=0, keepdims=True)
                     + jnp.min(v, axis=1, keepdims=True))          # [1, 1]
    row_f = jnp.exp(jnp.clip(c_row - s_shift, -80.0, 80.0))        # [TQ, 1]
    col_f = jnp.exp(jnp.clip(s_shift - v, -80.0, 80.0))            # [1,  B]

    er = e_all * row_f                                             # [TQ, B]
    pr = p * row_f                                                 # [TQ, B]
    e_col = e_col_ref[...] * rescale + col_f * jnp.sum(er, axis=0, keepdims=True)
    a_col = a_col_ref[...] * rescale + col_f * jnp.sum(pr, axis=0, keepdims=True)
    e_col_ref[...] = e_col
    a_col_ref[...] = a_col
    m_col_ref[...] = m_new

    @pl.when(q == nq - 1)
    def _finalize():
        new_b_T = m_new                                            # [1, B]
        old_s_T = sT_old_ref[1:2, :]
        # Analytic diagonal subtraction on the column side (once, at the end).
        e_diag_c = jnp.exp(-new_b_T)
        e_col_m = e_col - e_diag_c
        a_colT_m = a_col - dT_c * e_diag_c
        g_T = e_col_m / denom
        s_T = (1.0 - gamma) * old_s_T * jnp.exp(old_b_T - new_b_T) + gamma * g_T
        sT_new_ref[0:1, :] = new_b_T
        sT_new_ref[1:2, :] = s_T
        s_T_c = jnp.maximum(s_T, eps)
        txt_cols = (a_colT_m - dT_c * e_col_m) * (T / denom) / s_T_c   # [1, B]
        img_mean = img_total / float(B)                            # [1, 1]
        txt_mean = jnp.sum(txt_cols, axis=1, keepdims=True) / float(B)
        loss_ref[...] = alpha_weight * img_mean + (1.0 - alpha_weight) * txt_mean


class SogCLRLossPallas:
    """JAX/Pallas port of SogCLR_Loss (forward only, detached-style semantics)."""

    def __init__(self, batch_size, temperature, alpha_weight,
                 N=1024, gamma=0.8, tile_q=None):
        self.batch_size = int(batch_size)
        self.temperature = float(temperature)
        self.alpha_weight = float(alpha_weight)
        self.gamma = float(gamma)
        self.eps = 1e-14
        self.N = int(N)
        self._tile_q_override = tile_q
        # State rows: 0 = b_I, 1 = b_T, 2 = s_I, 3 = s_T (one [4,N] buffer ->
        # a single gather and a single scatter per step).
        self.state = jnp.zeros((4, self.N), jnp.float32)
        self._kernels = {}

    # ------------------------------------------------------------------ utils
    @staticmethod
    def _vmem_cap():
        # ~90% of detected per-core VMEM; conservative fallback otherwise.
        try:
            info_fn = getattr(pltpu, "get_tpu_info", None)
            if info_fn is not None:
                cap = int(getattr(info_fn(), "vmem_capacity_bytes", 0))
                if cap > 0:
                    return int(cap * 0.9)
        except Exception:
            pass
        return 60 * 1024 * 1024

    @staticmethod
    def _vmem_estimate(B, TQ, Dp):
        return (2 * Dp * B * 2          # zjt bf16 (double-buffered by the pipeline)
                + 2 * TQ * Dp * 2       # zq row tile bf16 (double-buffered)
                + 6 * TQ * B * 4        # live [TQ,B] f32 temporaries
                + 32 * B * 4            # [1,B]/[2,B] blocks, scratch, state tiles
                + (2 << 20))            # slack

    def _choose_tile(self, B, Dp, cap):
        if self._tile_q_override is not None:
            tq = int(self._tile_q_override)
            assert B % tq == 0, "tile_q must divide batch_size"
            assert tq == B or tq % 8 == 0, "tile_q must be a multiple of 8"
            return tq
        budget = int(cap * 0.85)
        cands = [B] + [c for c in (512, 384, 256, 128, 64, 32, 16, 8)
                       if c < B and B % c == 0]
        for c in cands:
            if self._vmem_estimate(B, c, Dp) <= budget:
                return c
        return cands[-1]

    # ------------------------------------------------------------------ build
    def _build(self, Dp):
        B = self.batch_size
        cap = self._vmem_cap()
        TQ = self._choose_tile(B, Dp, cap)
        nq = B // TQ
        f32 = jnp.float32

        kern = functools.partial(
            _sogclr_kernel,
            batch_size=B, temperature=self.temperature,
            gamma=self.gamma, alpha_weight=self.alpha_weight, eps=self.eps)

        grid_spec = pltpu.PrefetchScalarGridSpec(
            num_scalar_prefetch=0,
            grid=(nq,),
            in_specs=[
                pl.BlockSpec((TQ, Dp), lambda q: (q, 0)),   # zq rows  (bf16, 1/T folded)
                pl.BlockSpec((Dp, B), lambda q: (0, 0)),    # zjt      (bf16, contraction-major)
                pl.BlockSpec((TQ, 1), lambda q: (q, 0)),    # diag/T   (row orientation)
                pl.BlockSpec((1, B), lambda q: (0, 0)),     # diag/T   (col orientation)
                pl.BlockSpec((TQ, 2), lambda q: (q, 0)),    # old (b_I, s_I)
                pl.BlockSpec((2, B), lambda q: (0, 0)),     # old (b_T, s_T)
            ],
            out_specs=(
                pl.BlockSpec((1, 1), lambda q: (0, 0)),     # loss
                pl.BlockSpec((TQ, 2), lambda q: (q, 0)),    # new (b_I, s_I)
                pl.BlockSpec((2, B), lambda q: (0, 0)),     # new (b_T, s_T) lane-dense
            ),
            scratch_shapes=[
                pltpu.VMEM((1, B), f32),   # running column max
                pltpu.VMEM((1, B), f32),   # sum_i exp(txt_dt - m)
                pltpu.VMEM((1, B), f32),   # sum_i exp(txt_dt - m) * simT
                pltpu.VMEM((1, 1), f32),   # image-loss accumulator
            ],
        )

        est = self._vmem_estimate(B, TQ, Dp)
        vmem_limit = int(min(cap, max(est + (8 << 20), 32 << 20)))

        return pl.pallas_call(
            kern,
            out_shape=(
                jax.ShapeDtypeStruct((1, 1), f32),
                jax.ShapeDtypeStruct((B, 2), f32),
                jax.ShapeDtypeStruct((2, B), f32),
            ),
            grid_spec=grid_spec,
            compiler_params=pltpu.CompilerParams(
                dimension_semantics=("arbitrary",),   # grid carries the column accumulators
                vmem_limit_bytes=vmem_limit,
            ),
        )

    # ------------------------------------------------------------------- call
    def __call__(self, zis, zjs, ids):
        B = self.batch_size
        D = zis.shape[1]
        Dp = ((D + 127) // 128) * 128
        inv_t = 1.0 / self.temperature

        # ---- single gather of all per-sample state ----
        old = self.state[:, ids]                               # [4, B]
        sI_old = jnp.stack([old[0], old[2]], axis=1)           # [B, 2] (b_I, s_I)
        sT_old = jnp.stack([old[1], old[3]], axis=0)           # [2, B] (b_T, s_T)

        # ---- normalize + fold 1/T + bf16 cast ONCE in the wrapper ----
        zi = zis.astype(jnp.float32)
        zj = zjs.astype(jnp.float32)
        zi = zi / jnp.maximum(jnp.sqrt(jnp.sum(zi * zi, axis=1, keepdims=True)), 1e-12)
        zj = zj / jnp.maximum(jnp.sqrt(jnp.sum(zj * zj, axis=1, keepdims=True)), 1e-12)
        zq = (zi * inv_t).astype(jnp.bfloat16)                 # [B, D] (LHS, scaled)
        zn = zj.astype(jnp.bfloat16)                           # [B, D] (RHS)

        # diag of simT, consistent with the bf16 MXU matmul in the kernel
        diagT = jnp.sum(zq.astype(jnp.float32) * zn.astype(jnp.float32), axis=1)
        diagT_r = diagT.reshape(B, 1)
        diagT_c = diagT.reshape(1, B)

        # ---- zero-pad features to a lane multiple (preserves dots) ----
        if Dp != D:
            pad = ((0, 0), (0, Dp - D))
            zq = jnp.pad(zq, pad)
            zn = jnp.pad(zn, pad)
        zjt = zn.T                                             # [Dp, B] contraction-major

        key = (int(Dp),)
        if key not in self._kernels:
            self._kernels[key] = self._build(Dp)
        loss, sI_new, sT_new = self._kernels[key](
            zq, zjt, diagT_r, diagT_c, sI_old, sT_old)

        # ---- single scatter of the updated state ----
        new_all = jnp.stack(
            [sI_new[:, 0], sT_new[0], sI_new[:, 1], sT_new[1]], axis=0)   # [4, B]
        # TODO(synk): functionalize this buffer update for jax.jit / donation.
        self.state = self.state.at[:, ids].set(new_all)
        return loss[0, 0]


def _reference(zis, zjs, old_b_I, old_b_T, old_s_I, old_s_T,
               temperature, gamma, alpha_weight, eps, kernel_rounding=False):
    """Pure-JAX mirror of the PyTorch forward (optionally kernel-matched rounding)."""
    B = zis.shape[0]
    zis = zis.astype(jnp.float32)
    zjs = zjs.astype(jnp.float32)
    zis = zis / jnp.maximum(jnp.linalg.norm(zis, axis=1, keepdims=True), 1e-12)
    zjs = zjs / jnp.maximum(jnp.linalg.norm(zjs, axis=1, keepdims=True), 1e-12)
    if kernel_rounding:
        a = (zis / temperature).astype(jnp.bfloat16).astype(jnp.float32)
        b = zjs.astype(jnp.bfloat16).astype(jnp.float32)
        sim = jnp.einsum('id,jd->ij', a, b,
                         precision=lax.Precision.HIGHEST) * temperature
    else:
        sim = jnp.einsum('id,jd->ij', zis, zjs, precision=lax.Precision.HIGHEST)
    diag = jnp.diagonal(sim)
    image_diffs = sim - diag[:, None]
    text_diffs = sim - diag[None, :]
    img_dt = image_diffs / temperature
    txt_dt = text_diffs / temperature
    new_b_I = jnp.max(jnp.maximum(img_dt, old_b_I[:, None]), axis=1)
    new_b_T = jnp.max(jnp.maximum(txt_dt, old_b_T[None, :]), axis=0)
    mask = 1.0 - jnp.eye(B, dtype=jnp.float32)
    exp_img = jnp.exp(img_dt - new_b_I[:, None]) * mask
    exp_txt = jnp.exp(txt_dt - new_b_T[None, :]) * mask
    g_I = jnp.sum(exp_img, axis=1) / (B - 1)
    g_T = jnp.sum(exp_txt, axis=0) / (B - 1)
    s_I = (1.0 - gamma) * old_s_I * jnp.exp(old_b_I - new_b_I) + gamma * g_I
    s_T = (1.0 - gamma) * old_s_T * jnp.exp(old_b_T - new_b_T) + gamma * g_T
    s_I_c = jnp.maximum(s_I, eps)
    s_T_c = jnp.maximum(s_T, eps)
    w_img = exp_img / s_I_c[:, None]
    w_txt = exp_txt / s_T_c[None, :]
    image_loss = jnp.sum(w_img * image_diffs, axis=1) / (B - 1)
    text_loss = jnp.sum(w_txt * text_diffs, axis=0) / (B - 1)
    loss = alpha_weight * image_loss.mean() + (1.0 - alpha_weight) * text_loss.mean()
    new_state = jnp.stack([new_b_I, new_b_T, s_I, s_T], axis=0)
    return loss, new_state


if __name__ == "__main__":
    def check_case(B, D, N, tile_q, temperature, alpha, gamma, seed):
        key = jax.random.PRNGKey(seed)
        mod = SogCLRLossPallas(batch_size=B, temperature=temperature,
                               alpha_weight=alpha, N=N, gamma=gamma, tile_q=tile_q)
        ids = jnp.arange(B, dtype=jnp.int32)
        for _step in range(2):   # second step exercises non-zero running state
            key, k1, k2 = jax.random.split(key, 3)
            zis = jax.random.normal(k1, (B, D), jnp.float32)
            zjs = jax.random.normal(k2, (B, D), jnp.float32)
            old = mod.state[:, ids]
            loss = mod(zis, zjs, ids)
            loss = jax.block_until_ready(loss)
            new = mod.state[:, ids]
            assert bool(jnp.isfinite(loss)), "non-finite loss"
            # Tight check vs. a reference using the same bf16-rounded matmul.
            rl_b, rs_b = _reference(zis, zjs, old[0], old[1], old[2], old[3],
                                    temperature, gamma, alpha, 1e-14,
                                    kernel_rounding=True)
            assert jnp.allclose(loss, rl_b, rtol=1e-2, atol=1e-3), (float(loss), float(rl_b))
            assert jnp.allclose(new, rs_b, rtol=1e-2, atol=1e-3), "state mismatch (bf16 ref)"
            # Loose check vs. the full-f32 PyTorch-mirror reference.
            rl_f, rs_f = _reference(zis, zjs, old[0], old[1], old[2], old[3],
                                    temperature, gamma, alpha, 1e-14,
                                    kernel_rounding=False)
            assert jnp.allclose(loss, rl_f, rtol=1e-1, atol=2e-2), (float(loss), float(rl_f))
            assert jnp.allclose(new, rs_f, rtol=1e-1, atol=3e-2), "state mismatch (f32 ref)"

    # Single-tile path (B == tile_q), moderate temperature.
    check_case(B=8, D=32, N=64, tile_q=None, temperature=0.5, alpha=0.5, gamma=0.8, seed=0)
    # Multi-tile path (exercises the online cross-tile column accumulators and
    # the rank-1 exp correction at a lower temperature).
    check_case(B=16, D=32, N=64, tile_q=8, temperature=0.1, alpha=0.3, gamma=0.8, seed=1)
    print("KERNEL_OK")
</pallas_src>

<mosaic_0001>
module attributes {stable_mosaic.version = 11 : i64} {
  func.func @_sogclr_kernel(%arg0: i32, %arg1: memref<8x128xbf16, #tpu.memory_space<vmem>>, %arg2: memref<128x8xbf16, #tpu.memory_space<vmem>>, %arg3: memref<8x1xf32, #tpu.memory_space<vmem>>, %arg4: memref<1x8xf32, #tpu.memory_space<vmem>>, %arg5: memref<8x2xf32, #tpu.memory_space<vmem>>, %arg6: memref<2x8xf32, #tpu.memory_space<vmem>>, %arg7: memref<1x1xf32, #tpu.memory_space<vmem>>, %arg8: memref<8x2xf32, #tpu.memory_space<vmem>>, %arg9: memref<2x8xf32, #tpu.memory_space<vmem>>, %arg10: memref<1x8xf32, #tpu.memory_space<vmem>>, %arg11: memref<1x8xf32, #tpu.memory_space<vmem>>, %arg12: memref<1x8xf32, #tpu.memory_space<vmem>>, %arg13: memref<1x1xf32, #tpu.memory_space<vmem>>) attributes {dimension_semantics = [#tpu.dimension_semantics<arbitrary>], iteration_bounds = array<i64: 1>, scalar_prefetch = 0 : i64, scratch_operands = 4 : i64, tpu.core_type = #tpu.core_type<tc>, window_params = [{transform_indices = @transform_0, window_bounds = array<i64: 8, 128>}, {pipeline_mode = #tpu.pipeline_mode<synchronous>, transform_indices = @transform_1, window_bounds = array<i64: 128, 8>}, {transform_indices = @transform_2, window_bounds = array<i64: 8, 1>}, {pipeline_mode = #tpu.pipeline_mode<synchronous>, transform_indices = @transform_3, window_bounds = array<i64: 1, 8>}, {transform_indices = @transform_4, window_bounds = array<i64: 8, 2>}, {pipeline_mode = #tpu.pipeline_mode<synchronous>, transform_indices = @transform_5, window_bounds = array<i64: 2, 8>}, {pipeline_mode = #tpu.pipeline_mode<synchronous>, transform_indices = @transform_6, window_bounds = array<i64: 1, 1>}, {transform_indices = @transform_7, window_bounds = array<i64: 8, 2>}, {pipeline_mode = #tpu.pipeline_mode<synchronous>, transform_indices = @transform_8, window_bounds = array<i64: 2, 8>}]} {
    %c0 = arith.constant 0 : index
    %c0_0 = arith.constant 0 : index
    %0 = vector.load %arg6[%c0, %c0_0] : memref<2x8xf32, #tpu.memory_space<vmem>>, vector<1x8xf32>
    %c0_i32 = arith.constant 0 : i32
    %1 = arith.cmpi eq, %arg0, %c0_i32 : i32
    %2 = arith.extui %1 : i1 to i32
    %c0_i32_1 = arith.constant 0 : i32
    %3 = arith.cmpi ne, %2, %c0_i32_1 : i32
    scf.if %3 {
      %c0_55 = arith.constant 0 : index
      %c0_56 = arith.constant 0 : index
      %105 = vector.load %arg10[%c0_55, %c0_56] : memref<1x8xf32, #tpu.memory_space<vmem>>, vector<1x8xf32>
      tpu.vector_store %arg10[%c0_55, %c0_56], %0 {strides = array<i32>} : memref<1x8xf32, #tpu.memory_space<vmem>>, vector<1x8xf32>,
      %cst_57 = arith.constant 0.000000e+00 : f32
      %106 = vector.broadcast %cst_57 : f32 to vector<1x8xf32>
      %c0_58 = arith.constant 0 : index
      %c0_59 = arith.constant 0 : index
      %107 = vector.load %arg11[%c0_58, %c0_59] : memref<1x8xf32, #tpu.memory_space<vmem>>, vector<1x8xf32>
      tpu.vector_store %arg11[%c0_58, %c0_59], %106 {strides = array<i32>} : memref<1x8xf32, #tpu.memory_space<vmem>>, vector<1x8xf32>,
      %cst_60 = arith.constant 0.000000e+00 : f32
      %108 = vector.broadcast %cst_60 : f32 to vector<1x8xf32>
      %c0_61 = arith.constant 0 : index
      %c0_62 = arith.constant 0 : index
      %109 = vector.load %arg12[%c0_61, %c0_62] : memref<1x8xf32, #tpu.memory_space<vmem>>, vector<1x8xf32>
      tpu.vector_store %arg12[%c0_61, %c0_62], %108 {strides = array<i32>} : memref<1x8xf32, #tpu.memory_space<vmem>>, vector<1x8xf32>,
      %cst_63 = arith.constant 0.000000e+00 : f32
      %110 = vector.broadcast %cst_63 : f32 to vector<1x1xf32>
      %c0_64 = arith.constant 0 : index
      %c0_65 = arith.constant 0 : index
      %111 = vector.load %arg13[%c0_64, %c0_65] : memref<1x1xf32, #tpu.memory_space<vmem>>, vector<1x1xf32>
      tpu.vector_store %arg13[%c0_64, %c0_65], %110 {strides = array<i32>} : memref<1x1xf32, #tpu.memory_space<vmem>>, vector<1x1xf32>,
    } else {
    }
    %c0_2 = arith.constant 0 : index
    %c0_3 = arith.constant 0 : index
    %4 = vector.load %arg1[%c0_2, %c0_3] : memref<8x128xbf16, #tpu.memory_space<vmem>>, vector<8x128xbf16>
    %c0_4 = arith.constant 0 : index
    %c0_5 = arith.constant 0 : index
    %5 = vector.load %arg2[%c0_4, %c0_5] : memref<128x8xbf16, #tpu.memory_space<vmem>>, vector<128x8xbf16>
    %cst = arith.constant dense<0.000000e+00> : vector<8x8xf32>
    %6 = tpu.matmul %4, %5, %cst {dimension_numbers = #tpu.dot_dimension_numbers<[1], [0], [0], [1], [0, 0, 1, 1], [], []>} : vector<8x128xbf16>, vector<128x8xbf16>, vector<8x8xf32> -> vector<8x8xf32>
    %c0_6 = arith.constant 0 : index
    %c0_7 = arith.constant 0 : index
    %7 = vector.load %arg3[%c0_6, %c0_7] : memref<8x1xf32, #tpu.memory_space<vmem>>, vector<8x1xf32>
    %c0_8 = arith.constant 0 : index
    %c0_9 = arith.constant 0 : index
    %8 = vector.load %arg4[%c0_8, %c0_9] : memref<1x8xf32, #tpu.memory_space<vmem>>, vector<1x8xf32>
    %c0_10 = arith.constant 0 : index
    %c0_11 = arith.constant 0 : index
    %9 = vector.load %arg5[%c0_10, %c0_11] : memref<8x2xf32, #tpu.memory_space<vmem>>, vector<8x1xf32>
    %c0_12 = arith.constant 0 : index
    %c1 = arith.constant 1 : index
    %10 = vector.load %arg5[%c0_12, %c1] : memref<8x2xf32, #tpu.memory_space<vmem>>, vector<8x1xf32>
    %cst_13 = arith.constant dense<0xFF800000> : vector<8xf32>
    %11 = vector.multi_reduction <maximumf>, %6, %cst_13 [1] : vector<8x8xf32> to vector<8xf32>
    %12 = vector.shape_cast %11 : vector<8xf32> to vector<8x1xf32>
    %13 = arith.subf %12, %7 : vector<8x1xf32>
    %14 = arith.maximumf %13, %9 : vector<8x1xf32>
    %15 = arith.addf %7, %14 : vector<8x1xf32>
    %16 = vector.broadcast %15 : vector<8x1xf32> to vector<8x8xf32>
    %17 = arith.subf %6, %16 : vector<8x8xf32>
    %18 = math.exp %17 : vector<8x8xf32>
    %19 = arith.mulf %18, %6 : vector<8x8xf32>
    %cst_14 = arith.constant 0.000000e+00 : f32
    %20 = vector.broadcast %cst_14 : f32 to vector<8x1xf32>
    %21 = arith.subf %20, %14 : vector<8x1xf32>
    %22 = math.exp %21 : vector<8x1xf32>
    %cst_15 = arith.constant dense<0.000000e+00> : vector<8xf32>
    %23 = vector.multi_reduction <add>, %18, %cst_15 [1] : vector<8x8xf32> to vector<8xf32>
    %24 = vector.shape_cast %23 : vector<8xf32> to vector<8x1xf32>
    %25 = arith.subf %24, %22 : vector<8x1xf32>
    %cst_16 = arith.constant dense<0.000000e+00> : vector<8xf32>
    %26 = vector.multi_reduction <add>, %19, %cst_16 [1] : vector<8x8xf32> to vector<8xf32>
    %27 = vector.shape_cast %26 : vector<8xf32> to vector<8x1xf32>
    %28 = arith.mulf %7, %22 : vector<8x1xf32>
    %29 = arith.subf %27, %28 : vector<8x1xf32>
    %cst_17 = arith.constant 7.000000e+00 : f32
    %30 = vector.broadcast %cst_17 : f32 to vector<8x1xf32>
    %31 = arith.divf %25, %30 : vector<8x1xf32>
    %cst_18 = arith.constant 2.000000e-01 : f32
    %32 = vector.broadcast %cst_18 : f32 to vector<8x1xf32>
    %33 = arith.mulf %32, %10 : vector<8x1xf32>
    %34 = arith.subf %9, %14 : vector<8x1xf32>
    %35 = math.exp %34 : vector<8x1xf32>
    %36 = arith.mulf %33, %35 : vector<8x1xf32>
    %cst_19 = arith.constant 8.000000e-01 : f32
    %37 = vector.broadcast %cst_19 : f32 to vector<8x1xf32>
    %38 = arith.mulf %37, %31 : vector<8x1xf32>
    %39 = arith.addf %36, %38 : vector<8x1xf32>
    %c0_20 = arith.constant 0 : index
    %c0_21 = arith.constant 0 : index
    %40 = vector.load %arg8[%c0_20, %c0_21] : memref<8x2xf32, #tpu.memory_space<vmem>>, vector<8x1xf32>
    tpu.vector_store %arg8[%c0_20, %c0_21], %14 {strides = array<i32>} : memref<8x2xf32, #tpu.memory_space<vmem>>, vector<8x1xf32>,
    %c0_22 = arith.constant 0 : index
    %c1_23 = arith.constant 1 : index
    %41 = vector.load %arg8[%c0_22, %c1_23] : memref<8x2xf32, #tpu.memory_space<vmem>>, vector<8x1xf32>
    tpu.vector_store %arg8[%c0_22, %c1_23], %39 {strides = array<i32>} : memref<8x2xf32, #tpu.memory_space<vmem>>, vector<8x1xf32>,
    %cst_24 = arith.constant 9.99999982E-15 : f32
    %42 = vector.broadcast %cst_24 : f32 to vector<8x1xf32>
    %43 = arith.maximumf %39, %42 : vector<8x1xf32>
    %44 = arith.mulf %7, %25 : vector<8x1xf32>
    %45 = arith.subf %29, %44 : vector<8x1xf32>
    %cst_25 = arith.constant 0.0714285746 : f32
    %46 = vector.broadcast %cst_25 : f32 to vector<8x1xf32>
    %47 = arith.mulf %45, %46 : vector<8x1xf32>
    %48 = arith.divf %47, %43 : vector<8x1xf32>
    %c0_26 = arith.constant 0 : index
    %c0_27 = arith.constant 0 : index
    %49 = vector.load %arg13[%c0_26, %c0_27] : memref<1x1xf32, #tpu.memory_space<vmem>>, vector<1x1xf32>
    %cst_28 = arith.constant dense<0.000000e+00> : vector<1xf32>
    %50 = vector.multi_reduction <add>, %48, %cst_28 [0] : vector<8x1xf32> to vector<1xf32>
    %51 = vector.shape_cast %50 : vector<1xf32> to vector<1x1xf32>
    %52 = arith.addf %49, %51 : vector<1x1xf32>
    %c0_29 = arith.constant 0 : index
    %c0_30 = arith.constant 0 : index
    %53 = vector.load %arg13[%c0_29, %c0_30] : memref<1x1xf32, #tpu.memory_space<vmem>>, vector<1x1xf32>
    tpu.vector_store %arg13[%c0_29, %c0_30], %52 {strides = array<i32>} : memref<1x1xf32, #tpu.memory_space<vmem>>, vector<1x1xf32>,
    %cst_31 = arith.constant dense<0xFF800000> : vector<8xf32>
    %54 = vector.multi_reduction <maximumf>, %6, %cst_31 [0] : vector<8x8xf32> to vector<8xf32>
    %55 = vector.shape_cast %54 : vector<8xf32> to vector<1x8xf32>
    %c0_32 = arith.constant 0 : index
    %c0_33 = arith.constant 0 : index
    %56 = vector.load %arg10[%c0_32, %c0_33] : memref<1x8xf32, #tpu.memory_space<vmem>>, vector<1x8xf32>
    %57 = arith.subf %55, %8 : vector<1x8xf32>
    %58 = arith.maximumf %56, %57 : vector<1x8xf32>
    %59 = arith.subf %56, %58 : vector<1x8xf32>
    %60 = math.exp %59 : vector<1x8xf32>
    %61 = arith.addf %8, %58 : vector<1x8xf32>
    %cst_34 = arith.constant dense<0xFF800000> : vector<1xf32>
    %62 = vector.multi_reduction <maximumf>, %15, %cst_34 [0] : vector<8x1xf32> to vector<1xf32>
    %63 = vector.shape_cast %62 : vector<1xf32> to vector<1x1xf32>
    %cst_35 = arith.constant dense<0x7F800000> : vector<1xf32>
    %64 = vector.multi_reduction <minimumf>, %61, %cst_35 [1] : vector<1x8xf32> to vector<1xf32>
    %65 = vector.shape_cast %64 : vector<1xf32> to vector<1x1xf32>
    %66 = arith.addf %63, %65 : vector<1x1xf32>
    %cst_36 = arith.constant 5.000000e-01 : f32
    %67 = vector.broadcast %cst_36 : f32 to vector<1x1xf32>
    %68 = arith.mulf %67, %66 : vector<1x1xf32>
    %69 = vector.broadcast %68 : vector<1x1xf32> to vector<8x1xf32>
    %70 = arith.subf %15, %69 : vector<8x1xf32>
    %cst_37 = arith.constant -8.000000e+01 : f32
    %cst_38 = arith.constant 8.000000e+01 : f32
    %71 = vector.broadcast %cst_37 : f32 to vector<8x1xf32>
    %72 = arith.maximumf %71, %70 : vector<8x1xf32>
    %73 = vector.broadcast %cst_38 : f32 to vector<8x1xf32>
    %74 = arith.minimumf %73, %72 : vector<8x1xf32>
    %75 = math.exp %74 : vector<8x1xf32>
    %76 = vector.broadcast %68 : vector<1x1xf32> to vector<1x8xf32>
    %77 = arith.subf %76, %61 : vector<1x8xf32>
    %cst_39 = arith.constant -8.000000e+01 : f32
    %cst_40 = arith.constant 8.000000e+01 : f32
    %78 = vector.broadcast %cst_39 : f32 to vector<1x8xf32>
    %79 = arith.maximumf %78, %77 : vector<1x8xf32>
    %80 = vector.broadcast %cst_40 : f32 to vector<1x8xf32>
    %81 = arith.minimumf %80, %79 : vector<1x8xf32>
    %82 = math.exp %81 : vector<1x8xf32>
    %83 = vector.broadcast %75 : vector<8x1xf32> to vector<8x8xf32>
    %84 = arith.mulf %18, %83 : vector<8x8xf32>
    %85 = vector.broadcast %75 : vector<8x1xf32> to vector<8x8xf32>
    %86 = arith.mulf %19, %85 : vector<8x8xf32>
    %c0_41 = arith.constant 0 : index
    %c0_42 = arith.constant 0 : index
    %87 = vector.load %arg11[%c0_41, %c0_42] : memref<1x8xf32, #tpu.memory_space<vmem>>, vector<1x8xf32>
    %88 = arith.mulf %87, %60 : vector<1x8xf32>
    %cst_43 = arith.constant dense<0.000000e+00> : vector<8xf32>
    %89 = vector.multi_reduction <add>, %84, %cst_43 [0] : vector<8x8xf32> to vector<8xf32>
    %90 = vector.shape_cast %89 : vector<8xf32> to vector<1x8xf32>
    %91 = arith.mulf %82, %90 : vector<1x8xf32>
    %92 = arith.addf %88, %91 : vector<1x8xf32>
    %c0_44 = arith.constant 0 : index
    %c0_45 = arith.constant 0 : index
    %93 = vector.load %arg12[%c0_44, %c0_45] : memref<1x8xf32, #tpu.memory_space<vmem>>, vector<1x8xf32>
    %94 = arith.mulf %93, %60 : vector<1x8xf32>
    %cst_46 = arith.constant dense<0.000000e+00> : vector<8xf32>
    %95 = vector.multi_reduction <add>, %86, %cst_46 [0] : vector<8x8xf32> to vector<8xf32>
    %96 = vector.shape_cast %95 : vector<8xf32> to vector<1x8xf32>
    %97 = arith.mulf %82, %96 : vector<1x8xf32>
    %98 = arith.addf %94, %97 : vector<1x8xf32>
    %c0_47 = arith.constant 0 : index
    %c0_48 = arith.constant 0 : index
    %99 = vector.load %arg11[%c0_47, %c0_48] : memref<1x8xf32, #tpu.memory_space<vmem>>, vector<1x8xf32>
    tpu.vector_store %arg11[%c0_47, %c0_48], %92 {strides = array<i32>} : memref<1x8xf32, #tpu.memory_space<vmem>>, vector<1x8xf32>,
    %c0_49 = arith.constant 0 : index
    %c0_50 = arith.constant 0 : index
    %100 = vector.load %arg12[%c0_49, %c0_50] : memref<1x8xf32, #tpu.memory_space<vmem>>, vector<1x8xf32>
    tpu.vector_store %arg12[%c0_49, %c0_50], %98 {strides = array<i32>} : memref<1x8xf32, #tpu.memory_space<vmem>>, vector<1x8xf32>,
    %c0_51 = arith.constant 0 : index
    %c0_52 = arith.constant 0 : index
    %101 = vector.load %arg10[%c0_51, %c0_52] : memref<1x8xf32, #tpu.memory_space<vmem>>, vector<1x8xf32>
    tpu.vector_store %arg10[%c0_51, %c0_52], %58 {strides = array<i32>} : memref<1x8xf32, #tpu.memory_space<vmem>>, vector<1x8xf32>,
    %c0_i32_53 = arith.constant 0 : i32
    %102 = arith.cmpi eq, %arg0, %c0_i32_53 : i32
    %103 = arith.extui %102 : i1 to i32
    %c0_i32_54 = arith.constant 0 : i32
    %104 = arith.cmpi ne, %103, %c0_i32_54 : i32
    scf.if %104 {
      %c1_55 = arith.constant 1 : index
      %c0_56 = arith.constant 0 : index
      %105 = vector.load %arg6[%c1_55, %c0_56] : memref<2x8xf32, #tpu.memory_space<vmem>>, vector<1x8xf32>
      %cst_57 = arith.constant 0.000000e+00 : f32
      %106 = vector.broadcast %cst_57 : f32 to vector<1x8xf32>
      %107 = arith.subf %106, %58 : vector<1x8xf32>
      %108 = math.exp %107 : vector<1x8xf32>
      %109 = arith.subf %92, %108 : vector<1x8xf32>
      %110 = arith.mulf %8, %108 : vector<1x8xf32>
      %111 = arith.subf %98, %110 : vector<1x8xf32>
      %cst_58 = arith.constant 7.000000e+00 : f32
      %112 = vector.broadcast %cst_58 : f32 to vector<1x8xf32>
      %113 = arith.divf %109, %112 : vector<1x8xf32>
      %cst_59 = arith.constant 2.000000e-01 : f32
      %114 = vector.broadcast %cst_59 : f32 to vector<1x8xf32>
      %115 = arith.mulf %114, %105 : vector<1x8xf32>
      %116 = arith.subf %0, %58 : vector<1x8xf32>
      %117 = math.exp %116 : vector<1x8xf32>
      %118 = arith.mulf %115, %117 : vector<1x8xf32>
      %cst_60 = arith.constant 8.000000e-01 : f32
      %119 = vector.broadcast %cst_60 : f32 to vector<1x8xf32>
      %120 = arith.mulf %119, %113 : vector<1x8xf32>
      %121 = arith.addf %118, %120 : vector<1x8xf32>
      %c0_61 = arith.constant 0 : index
      %c0_62 = arith.constant 0 : index
      %122 = vector.load %arg9[%c0_61, %c0_62] : memref<2x8xf32, #tpu.memory_space<vmem>>, vector<1x8xf32>
      tpu.vector_store %arg9[%c0_61, %c0_62], %58 {strides = array<i32>} : memref<2x8xf32, #tpu.memory_space<vmem>>, vector<1x8xf32>,
      %c1_63 = arith.constant 1 : index
      %c0_64 = arith.constant 0 : index
      %123 = vector.load %arg9[%c1_63, %c0_64] : memref<2x8xf32, #tpu.memory_space<vmem>>, vector<1x8xf32>
      tpu.vector_store %arg9[%c1_63, %c0_64], %121 {strides = array<i32>} : memref<2x8xf32, #tpu.memory_space<vmem>>, vector<1x8xf32>,
      %cst_65 = arith.constant 9.99999982E-15 : f32
      %124 = vector.broadcast %cst_65 : f32 to vector<1x8xf32>
      %125 = arith.maximumf %121, %124 : vector<1x8xf32>
      %126 = arith.mulf %8, %109 : vector<1x8xf32>
      %127 = arith.subf %111, %126 : vector<1x8xf32>
      %cst_66 = arith.constant 0.0714285746 : f32
      %128 = vector.broadcast %cst_66 : f32 to vector<1x8xf32>
      %129 = arith.mulf %127, %128 : vector<1x8xf32>
      %130 = arith.divf %129, %125 : vector<1x8xf32>
      %cst_67 = arith.constant 8.000000e+00 : f32
      %131 = vector.broadcast %cst_67 : f32 to vector<1x1xf32>
      %132 = arith.divf %52, %131 : vector<1x1xf32>
      %cst_68 = arith.constant dense<0.000000e+00> : vector<1xf32>
      %133 = vector.multi_reduction <add>, %130, %cst_68 [1] : vector<1x8xf32> to vector<1xf32>
      %134 = vector.shape_cast %133 : vector<1xf32> to vector<1x1xf32>
      %cst_69 = arith.constant 8.000000e+00 : f32
      %135 = vector.broadcast %cst_69 : f32 to vector<1x1xf32>
      %136 = arith.divf %134, %135 : vector<1x1xf32>
      %cst_70 = arith.constant 5.000000e-01 : f32
      %137 = vector.broadcast %cst_70 : f32 to vector<1x1xf32>
      %138 = arith.mulf %137, %132 : vector<1x1xf32>
      %cst_71 = arith.constant 5.000000e-01 : f32
      %139 = vector.broadcast %cst_71 : f32 to vector<1x1xf32>
      %140 = arith.mulf %139, %136 : vector<1x1xf32>
      %141 = arith.addf %138, %140 : vector<1x1xf32>
      %c0_72 = arith.constant 0 : index
      %c0_73 = arith.constant 0 : index
      %142 = vector.load %arg7[%c0_72, %c0_73] : memref<1x1xf32, #tpu.memory_space<vmem>>, vector<1x1xf32>
      tpu.vector_store %arg7[%c0_72, %c0_73], %141 {strides = array<i32>} : memref<1x1xf32, #tpu.memory_space<vmem>>, vector<1x1xf32>,
    } else {
    }
    return
  }
  func.func @transform_0(%arg0: i32) -> (i32, i32) {
    %c0_i32 = arith.constant 0 : i32
    %c0_i32_0 = arith.constant 0 : i32
    return %arg0, %c0_i32 : i32, i32
  }
  func.func @transform_1(%arg0: i32) -> (i32, i32) {
    %c0_i32 = arith.constant 0 : i32
    %c0_i32_0 = arith.constant 0 : i32
    %c0_i32_1 = arith.constant 0 : i32
    return %c0_i32, %c0_i32_0 : i32, i32
  }
  func.func @transform_2(%arg0: i32) -> (i32, i32) {
    %c0_i32 = arith.constant 0 : i32
    %c0_i32_0 = arith.constant 0 : i32
    return %arg0, %c0_i32 : i32, i32
  }
  func.func @transform_3(%arg0: i32) -> (i32, i32) {
    %c0_i32 = arith.constant 0 : i32
    %c0_i32_0 = arith.constant 0 : i32
    %c0_i32_1 = arith.constant 0 : i32
    return %c0_i32, %c0_i32_0 : i32, i32
  }
  func.func @transform_4(%arg0: i32) -> (i32, i32) {
    %c0_i32 = arith.constant 0 : i32
    %c0_i32_0 = arith.constant 0 : i32
    return %arg0, %c0_i32 : i32, i32
  }
  func.func @transform_5(%arg0: i32) -> (i32, i32) {
    %c0_i32 = arith.constant 0 : i32
    %c0_i32_0 = arith.constant 0 : i32
    %c0_i32_1 = arith.constant 0 : i32
    return %c0_i32, %c0_i32_0 : i32, i32
  }
  func.func @transform_6(%arg0: i32) -> (i32, i32) {
    %c0_i32 = arith.constant 0 : i32
    %c0_i32_0 = arith.constant 0 : i32
    %c0_i32_1 = arith.constant 0 : i32
    return %c0_i32, %c0_i32_0 : i32, i32
  }
  func.func @transform_7(%arg0: i32) -> (i32, i32) {
    %c0_i32 = arith.constant 0 : i32
    %c0_i32_0 = arith.constant 0 : i32
    return %arg0, %c0_i32 : i32, i32
  }
  func.func @transform_8(%arg0: i32) -> (i32, i32) {
    %c0_i32 = arith.constant 0 : i32
    %c0_i32_0 = arith.constant 0 : i32
    %c0_i32_1 = arith.constant 0 : i32
    return %c0_i32, %c0_i32_0 : i32, i32
  }
}

</mosaic_0001>

<bundles_post_ra>
// kernel: tpu_custom_call.1
= control target key start
LH: loop header
LB: loop body
LE: loop exit
PB: predicated region body
PF: predicated region fallthrough
CT: control target
= control target key end

     0   :  { %14 = vsyncpa [#allocation7], 0  ;;  %s681_s0 = inlined_call_operand.vmem [shape: bf16[8,128], index: 0, kind: input, shape index: {}]   ;;  %s682_s1 = inlined_call_operand.vmem [shape: bf16[128,8], index: 1, kind: input, shape index: {}]   ;;  %s683_s2 = inlined_call_operand.vmem [shape: f32[8,1], index: 2, kind: input, shape index: {}]   ;;  %s684_s3 = inlined_call_operand.vmem [shape: f32[1,8], index: 3, kind: input, shape index: {}]   ;;  %s685_s4 = inlined_call_operand.vmem [shape: f32[8,2], index: 4, kind: input, shape index: {}]   ;;  %s686_s5 = inlined_call_operand.vmem [shape: f32[2,8], index: 5, kind: input, shape index: {}]   ;;  %s687_s6 = inlined_call_operand.hbm [shape: f32[1,1], index: 6, kind: output, shape index: {0}]   ;;  %s688_s7 = inlined_call_operand.vmem [shape: f32[8,2], index: 7, kind: output, shape index: {1}]   ;;  %s689_s8 = inlined_call_operand.hbm [shape: f32[2,8], index: 8, kind: output, shape index: {2}]  }
   0x1   :  { %v415_v0 = vld [vmem:[%s682_s1 + $0x38] sm:$0xff]  ;;  %v414_v1 = vld [vmem:[%s682_s1 + $0x30] sm:$0xff] }
   0x2   :  { %104 = vmatpush.bf16.msra.mxu0 %v415_v0 }
   0x3   :  { %15 = vsyncpa [#allocation9], 0  ;;  %v413_v2 = vld [vmem:[%s682_s1 + $0x28] sm:$0xff]  ;;  %v412_v3 = vld [vmem:[%s682_s1 + $0x20] sm:$0xff]  ;;  %vm33_vm0 = vcmask 57344   ;;  %v502_v10 = vmov 0.0  }
   0x4   :  { %v411_v4 = vld [vmem:[%s682_s1 + $0x18] sm:$0xff]  ;;  %v410_v5 = vld [vmem:[%s682_s1 + $0x10] sm:$0xff]  ;;  %v409_v6 = vld [vmem:[%s682_s1 + $0x8] sm:$0xff]  ;;  %35 = vst.msk [vmem:[#allocation3] sm:$0x1] %vm33_vm0, %v502_v10  ;;  %vm120_vm1 = vcmask 64512  }
   0x5   :  { %v408_v7 = vld [vmem:[%s682_s1] sm:$0xff]  ;;  %36 = vst.msk [vmem:[#allocation4] sm:$0x1] %vm33_vm0, %v502_v10  ;;  %v503_v28 = vmov 0   ;;  %vm171_vm2 = vcmask 7168   ;;  %v504_v54 = vmov 7.0  }
   0x6   :  { %105 = vmatpush.bf16.msra.mxu0 %v414_v1  ;;  %v39_v8 = vld [vmem:[%s681_s0] sm:$0xf]  ;;  %424 = vset.pattern.permute.xlu0 %v503_v28  ;;  %s505_s30 = smov 1   ;;  %vm173_vm8 = vcmask 15368   ;;  %s506_s10 = smov 127   ;;  %vm37_vm9 = vcmask 0  }
   0x7   :  { %v585_v9 = vld [vmem:[%s686_s5] sm:$0x1]  ;;  %425 = vset.pattern.permute.xlu2 %v503_v28  ;;  %s507_s11 = smov [#allocation8]   ;;  %s358_s15 = sshll.u32 %s689_s8, 4  ;;  %38 = vst.msk [vmem:[#allocation5] sm:$0x1] %vm37_vm9, %v502_v10  ;;  %s359_s15 = int_to_ptr.hbm [resolvable:$true] %s358_s15 }
   0x8   :  { %34 = vst.msk [vmem:[#allocation2] sm:$0x1] %vm33_vm0, %v585_v9  ;;  %v597_v19 = vld [vmem:[%s684_s3] sm:$0x1]  ;;  %s356_s12 = sshll.u32 %s507_s11, 4  ;;  %s345_s18 = sshll.u32 %s687_s6, 4  ;;  %s357_s12 = int_to_ptr.vmem [resolvable:$true] %s356_s12  ;;  %s346_s18 = int_to_ptr.hbm [resolvable:$true] %s345_s18 }
   0x9   :  { %v618_v29 = vld [vmem:[%s683_s2] sm:$0xff] }
   0xa   :  { %106 = vmatpush.bf16.msra.mxu0 %v413_v2  ;;  %v623_v30 = vld [vmem:[%s685_s4] sm:$0xff] }
   0xe   :  { %107 = vmatpush.bf16.msra.mxu0 %v412_v3 }
   0xf   :  { %v215_v21 = vld [vmem:[#allocation2] sm:$0x1] }
  0x12   :  { %108 = vmatpush.bf16.msra.mxu0 %v411_v4 }
  0x16   :  { %109 = vmatpush.bf16.msra.mxu0 %v410_v5 }
  0x1a   :  { %110 = vmatpush.bf16.msra.mxu0 %v409_v6 }
  0x1e   :  { %111 = vmatpush.bf16.msra.mxu0 %v408_v7 }
  0x21   :  { %112 = vmatmul.bf16.vlgmr.msra.gmra.mxu0 %v39_v8 }
  0x9e   :  { %v113_v11 = vpop.f32.mrf.mxu0 }
  0x9f   :  { %v121_v12 = vsel %vm120_vm1, %v113_v11, -inf }
  0xa0   :  { %122 = vmax.xlane.f32.xlu0 %v121_v12  ;;  %v209_v13 = vrot.slane %v121_v12, 4 }
  0xa2   :  { %v210_v14 = vmax.f32 %v121_v12, %v209_v13 }
  0xa4   :  { %v211_v15 = vrot.slane %v210_v14, 2 }
  0xa6   :  { %v212_v16 = vmax.f32 %v210_v14, %v211_v15  ;;  %v115_v17 = vpop.f32.mrf.mxu0 }
  0xa8   :  { %v213_v18 = vrot.slane %v212_v16, 1 }
  0xaa   :  { %v214_v20 = vmax.f32 %v212_v16, %v213_v18 }
  0xac   :  { %v216_v22 = vsub.f32 %v214_v20, %v597_v19 }
  0xae   :  { %v600_v23 = vmax.f32 %v215_v21, %v216_v22 }
  0xb0   :  { %v604_v24 = vadd.f32 %v600_v23, %v597_v19  ;;  %282 = vst.msk [vmem:[#allocation2] sm:$0x1] %vm33_vm0, %v600_v23  ;;  %v218_v25 = vsub.f32 %v215_v21, %v600_v23  ;;  %v295_v26 = vsub.f32 %v585_v9, %v600_v23  ;;  %v287_v62 = vsub.f32 0.0, %v600_v23  ;;  %v286_v9 = vld [vmem:[%s686_s5 + $0x1] sm:$0x1] }
  0xb1   :  { %301 = vst.msk [vmem:[#allocation8] sm:$0x1] %vm33_vm0, %v600_v23 }
  0xb2   :  { %v230_v27 = vsel %vm33_vm0, %v604_v24, inf  ;;  %v219_v0 = vmul.f32 1.442695, %v218_v25  ;;  %v288_v7 = vmul.f32 1.442695, %v287_v62 }
  0xb3   :  { %231 = vmin.xlane.f32.xlu1 %v230_v27  ;;  %v258_v27 = vld [vmem:[#allocation3] sm:$0x1] }
 0x113   :  { %v123_v31 = vpop.xlane.xlu0 %122 }
 0x114   :  { %v124_v32 = vsub.f32 %v123_v31, %v618_v29 }
 0x116   :  { %v627_v33 = vmax.f32 %v124_v32, %v623_v30  ;;  %v269_v32 = vld [vmem:[#allocation4] sm:$0x1] }
 0x118   :  { %v126_v34 = vadd.f32 %v627_v33, %v618_v29  ;;  %172 = vst.msk [vmem:[%s688_s7] sm:$0xff] %vm171_vm2, %v627_v33  ;;  %v157_v17 = vsub.f32 %v623_v30, %v627_v33 }
 0x11a   :  { %129 = vperm.xlu0 %424, %v126_v34   ;;  %v222_v35 = vsel %vm171_vm2, %v126_v34, -inf  ;;  %v158_v28 = vmul.f32 1.442695, %v157_v17 }
 0x11b   :  { %v223_v36 = vrot.slane %v222_v35, 4 }
 0x11d   :  { %v224_v37 = vmax.f32 %v222_v35, %v223_v36 }
 0x11f   :  { %v225_v38 = vrot.slane %v224_v37, 2 }
 0x121   :  { %v226_v39 = vmax.f32 %v224_v37, %v225_v38 }
 0x123   :  { %v227_v40 = vrot.slane %v226_v39, 1 }
 0x125   :  { %v228_v41 = vmax.f32 %v226_v39, %v227_v40 }
 0x126   :  { %v232_v42 = vpop.xlane.xlu1 %231 }
 0x127   :  { %v233_v43 = vadd.f32 %v232_v42, %v228_v41 }
 0x129   :  { %v234_v44 = vmul.f32 0.5, %v233_v43 }
 0x12b   :  { %v235_v45 = vperm.slane %v234_v44, 0 }
 0x12d   :  { %v236_v46 = vsub.f32 %v126_v34, %v235_v45 }
 0x12f   :  { %v406_v47 = vclamps-f32 %v236_v46, 80.0  ;;  %v294_v46 = vmul.f32 0.2, %v286_v9 }
 0x131   :  { %v239_v48 = vmul.f32 1.442695, %v406_v47 }
 0x133   :  { %426 = vpow2.f32 %v239_v48 }
 0x139   :  { %v427_v49 = vpop.eup %426 }
 0x13a   :  { %253 = vperm.xlu2 %425, %v427_v49  }
 0x142   :  { %243 = vperm.xlu2 %425, %v234_v44  }
 0x18c   :  { %v130_v50 = vpop.permute.xlu0 %129 }
 0x18d   :  { %v132_v51 = vsub.f32 %v113_v11, %v130_v50 }
 0x18f   :  { %v133_v52 = vmul.f32 1.442695, %v132_v51 }
 0x191   :  { %428 = vpow2.f32 %v133_v52 }
 0x192   :  { %430 = vrcp.f32 %v504_v54 }
 0x193   :  { %432 = vpow2.f32 %v219_v0 }
 0x194   :  { %v254_v53 = vpop.permute.xlu2 %253  ;;  %434 = vpow2.f32 %v288_v7 }
 0x197   :  { %v429_v55 = vpop.eup %428 }
 0x198   :  { %v637_v56 = vmul.f32 %v429_v55, %v113_v11  ;;  %v256_v57 = vmul.f32 %v429_v55, %v254_v53  ;;  %v139_v58 = vsel %vm120_vm1, %v429_v55, 0.0  ;;  %v431_v59 = vpop.eup %430 }
 0x199   :  { %140 = vadd.xlane.f32.xlu1 %v139_v58  ;;  %v149_v6 = vmul.f32 7.0, %v431_v59  ;;  %v433_v25 = vpop.eup %432  ;;  %vm153_vm3 = vweird.f32 %v431_v59 }
 0x19a   :  { %v257_v60 = vmul.f32 %v254_v53, %v637_v56  ;;  %v260_v61 = vsel %vm120_vm1, %v256_v57, 0.0  ;;  %v435_v34 = vpop.eup %434  ;;  %v259_v38 = vmul.f32 %v433_v25, %v258_v27  ;;  %v270_v41 = vmul.f32 %v433_v25, %v269_v32 }
 0x19b   :  { %v261_v63 = vrot.slane %v260_v61, 4  ;;  %v150_v16 = vsub.f32 1.0, %v149_v6  ;;  %v291_v42 = vmul.f32 %v435_v34, %v597_v19 }
 0x19c   :  { %v271_v1 = vsel %vm120_vm1, %v257_v60, 0.0  ;;  %v244_v2 = vpop.permute.xlu2 %243 }
 0x19d   :  { %v262_v3 = vadd.f32 %v261_v63, %v260_v61  ;;  %v272_v4 = vrot.slane %v271_v1, 4  ;;  %v246_v5 = vsub.f32 %v244_v2, %v604_v24  ;;  %v151_v22 = vmul.f32 %v431_v59, %v150_v16 }
 0x19e   :  { %v296_v24 = vmul.f32 1.442695, %v295_v26 }
 0x19f   :  { %v263_v8 = vrot.slane %v262_v3, 2  ;;  %v273_v11 = vadd.f32 %v272_v4, %v271_v1  ;;  %v407_v12 = vclamps-f32 %v246_v5, 80.0  ;;  %v152_v37 = vadd.f32 %v431_v59, %v151_v22 }
 0x1a0   :  { %v136_v5 = vsub.f32 0.0, %v627_v33 }
 0x1a1   :  { %v264_v13 = vadd.f32 %v263_v8, %v262_v3  ;;  %v274_v14 = vrot.slane %v273_v11, 2  ;;  %v249_v15 = vmul.f32 1.442695, %v407_v12  ;;  %v154_v43 = vsel %vm153_vm3, %v431_v59, %v152_v37 }
 0x1a2   :  { %v137_v6 = vmul.f32 1.442695, %v136_v5 }
 0x1a3   :  { %v275_v18 = vadd.f32 %v274_v14, %v273_v11  ;;  %436 = vpow2.f32 %v249_v15  ;;  %v265_v20 = vrot.slane %v264_v13, 1  ;;  %v156_v14 = vmul.f32 0.2, %v623_v30 }
 0x1a4   :  { %438 = vpow2.f32 %v296_v24 }
 0x1a5   :  { %v276_v21 = vrot.slane %v275_v18, 1  ;;  %v266_v35 = vadd.f32 %v265_v20, %v264_v13  ;;  %440 = vpow2.f32 %v158_v28  ;;  %v143_v20 = vsel %vm120_vm1, %v637_v56, 0.0 }
 0x1a6   :  { %v508_v56 = vmov 8.0  }
 0x1a7   :  { %v277_v31 = vadd.f32 %v276_v21, %v275_v18 }
 0x1a9   :  { %v437_v36 = vpop.eup %436 }
 0x1aa   :  { %v267_v39 = vmul.f32 %v437_v36, %v266_v35  ;;  %v278_v40 = vmul.f32 %v437_v36, %v277_v31  ;;  %v439_v47 = vpop.eup %438 }
 0x1ab   :  { %v441_v50 = vpop.eup %440  ;;  %v298_v51 = vmul.f32 %v439_v47, %v294_v46 }
 0x1ac   :  { %v268_v23 = vadd.f32 %v267_v39, %v259_v38  ;;  %v279_v26 = vadd.f32 %v278_v40, %v270_v41 }
 0x1ae   :  { %281 = vst.msk [vmem:[#allocation4] sm:$0x1] %vm33_vm0, %v279_v26  ;;  %v290_v44 = vsub.f32 %v268_v23, %v435_v34  ;;  %v292_v45 = vsub.f32 %v279_v26, %v291_v42 }
 0x1af   :  { %280 = vst.msk [vmem:[#allocation3] sm:$0x1] %vm33_vm0, %v268_v23 }
 0x1b0   :  { %v293_v48 = vmul.f32 %v290_v44, %v154_v43  ;;  %v304_v49 = vmul.f32 %v290_v44, %v597_v19 }
 0x1b2   :  { %161 = vrot.lane.b32.xlu1 %v441_v50, %s505_s30  ;;  %v299_v52 = vmul.f32 0.8, %v293_v48  ;;  %v305_v53 = vsub.f32 %v292_v45, %v304_v49 }
 0x1b4   :  { %v300_v54 = vadd.f32 %v299_v52, %v298_v51  ;;  %v306_v0 = vmul.f32 0.071428575, %v305_v53  ;;  %v198_v51 = vld [vmem:[#allocation5] sm:$0x1] }
 0x1b6   :  { %v303_v55 = vmax.f32 %v300_v54, 1e-14  ;;  %302 = vst.msk [vmem:[#allocation8 + $0x1] sm:$0x1] %vm33_vm0, %v300_v54 }
 0x1b7   :  { %361 = dma.vmem_to_hbm [thread:$0]  %s357_s12, 32, %s359_s15, [#allocation9]  }
 0x1b8   :  { %442 = vrcp.f32 %v303_v55  ;;  %v318_v60 = vand.u32 2147483648, %v303_v55  ;;  %v316_v62 = vand.u32 2147483647, %v303_v55  ;;  %vm312_vm5 = vweird.f32 %v303_v55 }
 0x1b9   :  { %444 = vpow2.f32 %v137_v6 }
 0x1ba   :  { %v319_v63 = vor.u32 1.1754944e-38, %v318_v60  ;;  %vm317_vm7 = vcmp.eq.f32.partialorder %v316_v62, 8.507059e+37 }
 0x1be   :  { %v443_v57 = vpop.eup %442 }
 0x1bf   :  { %v308_v58 = vmul.f32 %v443_v57, %v303_v55  ;;  %vm313_vm4 = vweird.f32 %v443_v57  ;;  %v445_v7 = vpop.eup %444 }
 0x1c0   :  { %vm314_vm6 = vmor %vm312_vm5, %vm313_vm4  ;;  %v146_v27 = vmul.f32 %v445_v7, %v618_v29 }
 0x1c1   :  { %v309_v59 = vsub.f32 1.0, %v308_v58 }
 0x1c3   :  { %v310_v61 = vmul.f32 %v443_v57, %v309_v59 }
 0x1c5   :  { %v311_v19 = vadd.f32 %v443_v57, %v310_v61 }
 0x1c7   :  { %v315_v1 = vsel %vm314_vm6, %v443_v57, %v311_v19 }
 0x1c8   :  { %v320_v2 = vsel %vm317_vm7, %v319_v63, %v315_v1 }
 0x1c9   :  { %v321_v3 = vmul.f32 %v320_v2, %v306_v0 }
 0x1cb   :  { %v330_v4 = vsel %vm33_vm0, %v321_v3, 0.0 }
 0x1dc   :  { %331 = vadd.xlane.f32.xlu1 %v330_v4 }
 0x20c   :  { %v141_v8 = vpop.xlane.xlu1 %140 }
 0x20d   :  { %v142_v11 = vsub.f32 %v141_v8, %v445_v7 }
 0x20f   :  { %v155_v12 = vmul.f32 %v154_v43, %v142_v11  ;;  %v176_v35 = vmul.f32 %v142_v11, %v618_v29 }
 0x211   :  { %v165_v13 = vmul.f32 0.8, %v155_v12 }
 0x213   :  { %167 = vrot.lane.b32.xlu2 %v165_v13, %s505_s30 }
 0x224   :  { %v162_v15 = vpop.permute.xlu1 %161 }
 0x225   :  { %v164_v16 = vmul.f32 %v162_v15, %v156_v14 }
 0x24f   :  { %v332_v50 = vpop.xlane.xlu1 %331 }
 0x26d   :  { %v168_v17 = vpop.permute.xlu2 %167 }
 0x26e   :  { %v170_v18 = vadd.f32 %v168_v17, %v164_v16 }
 0x270   :  { %174 = vst.msk [vmem:[%s688_s7] sm:$0xff] %vm173_vm8, %v170_v18  ;;  %v175_v33 = vmax.f32 %v170_v18, 1e-14  ;;  %s509_s7 = smov [#allocation6]  }
 0x271   :  { %s343_s8 = sshll.u32 %s509_s7, 4  ;;  %s344_s8 = int_to_ptr.vmem [resolvable:$true] %s343_s8 }
 0x272   :  { %180 = vrot.lane.b32.xlu2 %v175_v33, %s506_s10 }
 0x29b   :  { %144 = vadd.xlane.f32.xlu2 %v143_v20 }
 0x2cc   :  { %v181_v30 = vpop.permute.xlu2 %180 }
 0x2cd   :  { %446 = vrcp.f32 %v181_v30  ;;  %v194_v32 = vand.u32 2147483648, %v181_v30  ;;  %vm188_vm11 = vweird.f32 %v181_v30  ;;  %v192_v36 = vand.u32 2147483647, %v181_v30 }
 0x2ce   :  { %448 = vrcp.f32 %v508_v56 }
 0x2cf   :  { %v195_v40 = vor.u32 1.1754944e-38, %v194_v32  ;;  %vm193_vm13 = vcmp.eq.f32.partialorder %v192_v36, 8.507059e+37 }
 0x2d3   :  { %v447_v21 = vpop.eup %446 }
 0x2d4   :  { %v184_v22 = vmul.f32 %v447_v21, %v181_v30  ;;  %vm189_vm10 = vweird.f32 %v447_v21  ;;  %v449_v31 = vpop.eup %448 }
 0x2d5   :  { %vm190_vm12 = vmor %vm188_vm11, %vm189_vm10  ;;  %v323_v38 = vmul.f32 8.0, %v449_v31  ;;  %vm327_vm14 = vweird.f32 %v449_v31 }
 0x2d6   :  { %v185_v24 = vsub.f32 1.0, %v184_v22 }
 0x2d7   :  { %v324_v23 = vsub.f32 1.0, %v323_v38 }
 0x2d8   :  { %v186_v25 = vmul.f32 %v447_v21, %v185_v24 }
 0x2d9   :  { %v325_v44 = vmul.f32 %v449_v31, %v324_v23 }
 0x2da   :  { %v187_v28 = vadd.f32 %v447_v21, %v186_v25 }
 0x2db   :  { %v326_v29 = vadd.f32 %v449_v31, %v325_v44 }
 0x2dc   :  { %v191_v10 = vsel %vm190_vm12, %v447_v21, %v187_v28 }
 0x2dd   :  { %v196_v9 = vsel %vm193_vm13, %v195_v40, %v191_v10  ;;  %v328_v49 = vsel %vm327_vm14, %v449_v31, %v326_v29 }
 0x2de   :  { %v333_v53 = vmul.f32 %v332_v50, %v328_v49 }
 0x2e0   :  { %v335_v57 = vmul.f32 0.5, %v333_v53 }
 0x30e   :  { %v145_v34 = vpop.xlane.xlu2 %144 }
 0x30f   :  { %v147_v37 = vsub.f32 %v145_v34, %v146_v27 }
 0x311   :  { %v177_v39 = vsub.f32 %v147_v37, %v176_v35 }
 0x313   :  { %v178_v41 = vmul.f32 0.071428575, %v177_v39 }
 0x315   :  { %v197_v26 = vmul.f32 %v196_v9, %v178_v41 }
 0x317   :  { %v199_v42 = vsel %vm171_vm2, %v197_v26, 0.0 }
 0x318   :  { %v200_v43 = vrot.slane %v199_v42, 4 }
 0x31a   :  { %v201_v45 = vadd.f32 %v200_v43, %v199_v42 }
 0x31c   :  { %v202_v46 = vrot.slane %v201_v45, 2 }
 0x31e   :  { %v203_v47 = vadd.f32 %v202_v46, %v201_v45 }
 0x320   :  { %v204_v48 = vrot.slane %v203_v47, 1 }
 0x322   :  { %v205_v52 = vadd.f32 %v204_v48, %v203_v47 }
 0x324   :  { %v206_v54 = vadd.f32 %v205_v52, %v198_v51 }
 0x326   :  { %208 = vst.msk [vmem:[#allocation5] sm:$0x1] %vm37_vm9, %v206_v54  ;;  %v329_v55 = vmul.f32 %v328_v49, %v206_v54 }
 0x328   :  { %v334_v58 = vmul.f32 0.5, %v329_v55 }
 0x32a   :  { %v336_v59 = vadd.f32 %v335_v57, %v334_v58 }
 0x32c   :  { %337 = vst.msk [vmem:[#allocation6] sm:$0x1] %vm37_vm9, %v336_v59 }
 0x32d   :  { %348 = dma.vmem_to_hbm [thread:$0]  %s344_s8, 16, %s346_s18, [#allocation7]  }
 0x32e   :  { %498 = dma.done.wait [#allocation7], 16  }
 0x32f   :  { %499 = vsyncadd [#allocation7], 4294967280 }
 0x330   :  { %500 = dma.done.wait [#allocation9], 32  }
 0x331   :  { %501 = vsyncadd [#allocation9], 4294967264 }
 0x332   :  { %372 = vsyncpa [#allocation7], 1 }
 0x333   :  { %373 = vsyncpa [#allocation9], 1 }

</bundles_post_ra>
